<compile_context>
chip_gen: v5e
topology: v5e:2x2
jax: 0.10.0
libtpu: 0.0.40
codegen_flags: <defaults>
</compile_context>

<pallas_src>
import jax
import jax.numpy as jnp
from jax.experimental import pallas as pl
from jax.experimental.pallas import tpu as pltpu

HIDDEN = 128
_LANE = 128


def _round_up(x, m):
    return ((x + m - 1) // m) * m


def cvr_kernel(x_ref, w1_ref, b1_ref, w2_ref, b2_ref, o_ref):
    # x:  (TB, D)        w1: (D, 128)       b1: (1, 128) f32
    # w2: (1, 128) f32   b2: (1, 1)   f32   o:  (1, TB)  f32
    # Layer 1 on the MXU: cast operands to bf16 in VMEM (no extra HBM pass),
    # accumulate in f32, add bias, ReLU.
    x_bf = x_ref[...].astype(jnp.bfloat16)
    w1_bf = w1_ref[...].astype(jnp.bfloat16)
    h = jnp.dot(x_bf, w1_bf, preferred_element_type=jnp.float32)
    h = jnp.maximum(h + b1_ref[...], 0.0)
    # Layer 2 (128 -> 1) as an MXU contraction whose result is already a
    # lane-dense (1, TB) row: p[0, j] = sum_k w2[0, k] * h[j, k].
    p = jax.lax.dot_general(
        w2_ref[...].astype(jnp.bfloat16), h.astype(jnp.bfloat16),
        dimension_numbers=(((1,), (1,)), ((), ())),
        preferred_element_type=jnp.float32)
    z = p + b2_ref[...]
    o_ref[...] = (1.0 / (1.0 + jnp.exp(-z))).astype(o_ref.dtype)


def _pick_tile_b(B, D, requested):
    """Rows per batch tile, sized by a VMEM byte budget (not a row cap)."""
    if requested is None:
        # Per-row VMEM: double-buffered native x (<=4B/elt) + bf16 x copy +
        # f32/bf16 h; the budget leaves room for a (double-buffered) f32 W1
        # block plus compiler slack, and stays within a 40 MiB scoped limit.
        w1_bytes = 2 * 4 * D * HIDDEN
        budget = max(4 << 20, (22 << 20) - w1_bytes)
        per_row = 10 * D + 6 * HIDDEN + 64
        tb = min(budget // per_row, 8192)
        # Keep >= 2 tiles for large batches so both v7x TensorCores get work.
        if B >= 1024:
            tb = min(tb, _round_up((B + 1) // 2, _LANE))
    else:
        tb = max(8, int(requested))
    if tb >= B:
        return B                                 # single full-array block
    return max(_LANE, (tb // _LANE) * _LANE)     # lane-dense (1, tb) out blocks


def cvr_forward(x, w1, b1, w2, b2, *, tile_b=None):
    """sigmoid(relu(x @ w1 + b1) @ w2 + b2); x:(B,D), w1:(D,128), w2:(128,1)."""
    B, D = x.shape
    tb = _pick_tile_b(B, D, tile_b)
    grid = (pl.cdiv(B, tb),)

    # Only tiny reshapes/casts here -- no copies of x or W1 are materialized.
    b1_p = jnp.asarray(b1, jnp.float32).reshape(1, HIDDEN)
    w2_p = jnp.asarray(w2, jnp.float32).reshape(1, HIDDEN)   # (128,1) col -> row
    b2_p = jnp.asarray(b2, jnp.float32).reshape(1, 1)

    flops = 2 * B * D * HIDDEN + 2 * B * HIDDEN + 4 * B * HIDDEN
    bytes_accessed = (x.size * x.dtype.itemsize + w1.size * w1.dtype.itemsize
                      + (b1_p.size + w2_p.size + b2_p.size) * 4 + B * 4)

    # TODO(synk): for very large input_dim (~>32k) add a K grid axis marked
    # "arbitrary" with an f32 accumulator so W1 need not fit VMEM in one block
    # (matters on v7x's 64 MiB VMEM).
    out_row = pl.pallas_call(
        cvr_kernel,
        out_shape=jax.ShapeDtypeStruct((1, B), jnp.float32),
        grid_spec=pltpu.PrefetchScalarGridSpec(
            num_scalar_prefetch=0,
            grid=grid,
            in_specs=[
                pl.BlockSpec((tb, D), lambda i: (i, 0)),       # x batch tile
                pl.BlockSpec((D, HIDDEN), lambda i: (0, 0)),   # W1 (grid-invariant)
                pl.BlockSpec((1, HIDDEN), lambda i: (0, 0)),   # b1
                pl.BlockSpec((1, HIDDEN), lambda i: (0, 0)),   # W2 row
                pl.BlockSpec((1, 1), lambda i: (0, 0)),        # b2
            ],
            out_specs=pl.BlockSpec((1, tb), lambda i: (0, i)),
        ),
        compiler_params=pltpu.CompilerParams(
            dimension_semantics=("parallel",),
            vmem_limit_bytes=40 * 1024 * 1024,
        ),
        cost_estimate=pl.CostEstimate(
            flops=flops,
            transcendentals=B,
            bytes_accessed=bytes_accessed,
        ),
    )(x, w1, b1_p, w2_p, b2_p)
    return out_row.reshape(B, 1)


def init_params(key, input_dim):
    """Deterministic param init (PyTorch Linear-style uniform bounds)."""
    k1, k2, k3, k4 = jax.random.split(key, 4)
    bound1 = 1.0 / jnp.sqrt(input_dim)
    bound2 = 1.0 / jnp.sqrt(HIDDEN)
    w1 = jax.random.uniform(k1, (input_dim, HIDDEN), jnp.float32, -bound1, bound1)
    b1 = jax.random.uniform(k2, (1, HIDDEN), jnp.float32, -bound1, bound1)
    w2 = jax.random.uniform(k3, (HIDDEN, 1), jnp.float32, -bound2, bound2)
    b2 = jax.random.uniform(k4, (1, 1), jnp.float32, -bound2, bound2)
    return w1, b1, w2, b2


def cvr_reference(x, w1, b1, w2, b2):
    h = jnp.maximum(x @ w1 + b1, 0.0)
    return jax.nn.sigmoid(h @ w2 + b2)


if __name__ == "__main__":
    batch, input_dim = 8, 32
    key = jax.random.PRNGKey(0)
    kx, kx2, kp = jax.random.split(key, 3)

    x = jax.random.normal(kx, (batch, input_dim), jnp.float32)
    w1, b1, w2, b2 = init_params(kp, input_dim)

    out = jax.block_until_ready(cvr_forward(x, w1, b1, w2, b2))
    assert out.shape == (batch, 1)

    # f32 reference: kernel uses bf16 MXU operands for both layers, so allow a
    # small absolute tolerance on the post-sigmoid probabilities.
    ref = cvr_reference(x, w1, b1, w2, b2)
    assert jnp.allclose(out, ref, atol=1e-2, rtol=0.0), "mismatch vs f32 reference"
    assert bool(jnp.all((out > 0.0) & (out < 1.0))), "outputs not in (0, 1)"

    # Multi-tile + ragged-last-tile path (grid of 3, last tile partially OOB).
    batch2 = 272
    x2 = jax.random.normal(kx2, (batch2, input_dim), jnp.float32)
    out2 = jax.block_until_ready(cvr_forward(x2, w1, b1, w2, b2, tile_b=128))
    ref2 = cvr_reference(x2, w1, b1, w2, b2)
    assert out2.shape == (batch2, 1)
    assert jnp.allclose(out2, ref2, atol=1e-2, rtol=0.0), "mismatch (multi-tile)"

    print("KERNEL_OK")
</pallas_src>

<mosaic_0001>
module attributes {stable_mosaic.version = 11 : i64} {
  func.func @cvr_kernel(%arg0: i32, %arg1: memref<8x32xf32, #tpu.memory_space<vmem>>, %arg2: memref<32x128xf32, #tpu.memory_space<vmem>>, %arg3: memref<1x128xf32, #tpu.memory_space<vmem>>, %arg4: memref<1x128xf32, #tpu.memory_space<vmem>>, %arg5: memref<1x1xf32, #tpu.memory_space<vmem>>, %arg6: memref<1x8xf32, #tpu.memory_space<vmem>>) attributes {dimension_semantics = [#tpu.dimension_semantics<parallel>], iteration_bounds = array<i64: 1>, scalar_prefetch = 0 : i64, scratch_operands = 0 : i64, tpu.core_type = #tpu.core_type<tc>, window_params = [{transform_indices = @transform_0, window_bounds = array<i64: 8, 32>}, {pipeline_mode = #tpu.pipeline_mode<synchronous>, transform_indices = @transform_1, window_bounds = array<i64: 32, 128>}, {pipeline_mode = #tpu.pipeline_mode<synchronous>, transform_indices = @transform_2, window_bounds = array<i64: 1, 128>}, {pipeline_mode = #tpu.pipeline_mode<synchronous>, transform_indices = @transform_3, window_bounds = array<i64: 1, 128>}, {pipeline_mode = #tpu.pipeline_mode<synchronous>, transform_indices = @transform_4, window_bounds = array<i64: 1, 1>}, {transform_indices = @transform_5, window_bounds = array<i64: 1, 8>}]} {
    %c0 = arith.constant 0 : index
    %c0_0 = arith.constant 0 : index
    %0 = vector.load %arg1[%c0, %c0_0] : memref<8x32xf32, #tpu.memory_space<vmem>>, vector<8x32xf32>
    %1 = arith.truncf %0 : vector<8x32xf32> to vector<8x32xbf16>
    %c0_1 = arith.constant 0 : index
    %c0_2 = arith.constant 0 : index
    %2 = vector.load %arg2[%c0_1, %c0_2] : memref<32x128xf32, #tpu.memory_space<vmem>>, vector<32x128xf32>
    %3 = arith.truncf %2 : vector<32x128xf32> to vector<32x128xbf16>
    %cst = arith.constant dense<0.000000e+00> : vector<8x128xf32>
    %4 = tpu.matmul %1, %3, %cst {dimension_numbers = #tpu.dot_dimension_numbers<[1], [0], [0], [1], [0, 0, 1, 1], [], []>} : vector<8x32xbf16>, vector<32x128xbf16>, vector<8x128xf32> -> vector<8x128xf32>
    %c0_3 = arith.constant 0 : index
    %c0_4 = arith.constant 0 : index
    %5 = vector.load %arg3[%c0_3, %c0_4] : memref<1x128xf32, #tpu.memory_space<vmem>>, vector<1x128xf32>
    %6 = vector.broadcast %5 : vector<1x128xf32> to vector<8x128xf32>
    %7 = arith.addf %4, %6 : vector<8x128xf32>
    %cst_5 = arith.constant 0.000000e+00 : f32
    %8 = vector.broadcast %cst_5 : f32 to vector<8x128xf32>
    %9 = arith.maximumf %7, %8 : vector<8x128xf32>
    %c0_6 = arith.constant 0 : index
    %c0_7 = arith.constant 0 : index
    %10 = vector.load %arg4[%c0_6, %c0_7] : memref<1x128xf32, #tpu.memory_space<vmem>>, vector<1x128xf32>
    %11 = arith.truncf %10 : vector<1x128xf32> to vector<1x128xbf16>
    %12 = arith.truncf %9 : vector<8x128xf32> to vector<8x128xbf16>
    %cst_8 = arith.constant dense<0.000000e+00> : vector<1x8xf32>
    %13 = tpu.matmul %11, %12, %cst_8 {dimension_numbers = #tpu.dot_dimension_numbers<[1], [1], [0], [0], [0, 0, 1, 0], [], []>} : vector<1x128xbf16>, vector<8x128xbf16>, vector<1x8xf32> -> vector<1x8xf32>
    %c0_9 = arith.constant 0 : index
    %c0_10 = arith.constant 0 : index
    %14 = vector.load %arg5[%c0_9, %c0_10] : memref<1x1xf32, #tpu.memory_space<vmem>>, vector<1x1xf32>
    %15 = vector.broadcast %14 : vector<1x1xf32> to vector<1x8xf32>
    %16 = arith.addf %13, %15 : vector<1x8xf32>
    %cst_11 = arith.constant 0.000000e+00 : f32
    %17 = vector.broadcast %cst_11 : f32 to vector<1x8xf32>
    %18 = arith.subf %17, %16 : vector<1x8xf32>
    %19 = math.exp %18 : vector<1x8xf32>
    %cst_12 = arith.constant 1.000000e+00 : f32
    %20 = vector.broadcast %cst_12 : f32 to vector<1x8xf32>
    %21 = arith.addf %20, %19 : vector<1x8xf32>
    %cst_13 = arith.constant 1.000000e+00 : f32
    %22 = vector.broadcast %cst_13 : f32 to vector<1x8xf32>
    %23 = arith.divf %22, %21 : vector<1x8xf32>
    %c0_14 = arith.constant 0 : index
    %c0_15 = arith.constant 0 : index
    %24 = vector.load %arg6[%c0_14, %c0_15] : memref<1x8xf32, #tpu.memory_space<vmem>>, vector<1x8xf32>
    tpu.vector_store %arg6[%c0_14, %c0_15], %23 {strides = array<i32>} : memref<1x8xf32, #tpu.memory_space<vmem>>, vector<1x8xf32>,
    return
  }
  func.func @transform_0(%arg0: i32) -> (i32, i32) {
    %c0_i32 = arith.constant 0 : i32
    %c0_i32_0 = arith.constant 0 : i32
    return %arg0, %c0_i32 : i32, i32
  }
  func.func @transform_1(%arg0: i32) -> (i32, i32) {
    %c0_i32 = arith.constant 0 : i32
    %c0_i32_0 = arith.constant 0 : i32
    %c0_i32_1 = arith.constant 0 : i32
    return %c0_i32, %c0_i32_0 : i32, i32
  }
  func.func @transform_2(%arg0: i32) -> (i32, i32) {
    %c0_i32 = arith.constant 0 : i32
    %c0_i32_0 = arith.constant 0 : i32
    %c0_i32_1 = arith.constant 0 : i32
    return %c0_i32, %c0_i32_0 : i32, i32
  }
  func.func @transform_3(%arg0: i32) -> (i32, i32) {
    %c0_i32 = arith.constant 0 : i32
    %c0_i32_0 = arith.constant 0 : i32
    %c0_i32_1 = arith.constant 0 : i32
    return %c0_i32, %c0_i32_0 : i32, i32
  }
  func.func @transform_4(%arg0: i32) -> (i32, i32) {
    %c0_i32 = arith.constant 0 : i32
    %c0_i32_0 = arith.constant 0 : i32
    %c0_i32_1 = arith.constant 0 : i32
    return %c0_i32, %c0_i32_0 : i32, i32
  }
  func.func @transform_5(%arg0: i32) -> (i32, i32) {
    %c0_i32 = arith.constant 0 : i32
    %c0_i32_0 = arith.constant 0 : i32
    return %c0_i32, %arg0 : i32, i32
  }
}

</mosaic_0001>

<bundles_post_ra>
// kernel: tpu_custom_call.1
= control target key start
LH: loop header
LB: loop body
LE: loop exit
PB: predicated region body
PF: predicated region fallthrough
CT: control target
= control target key end

     0   :  { %s291_s0 = inlined_call_operand.hbm [shape: f32[8,32], index: 0, kind: input, shape index: {}]   ;;  %s292_s1 = inlined_call_operand.hbm [shape: f32[32,128], index: 1, kind: input, shape index: {}]   ;;  %s293_s2 = inlined_call_operand.vmem [shape: f32[1,128], index: 2, kind: input, shape index: {}]   ;;  %s294_s3 = inlined_call_operand.vmem [shape: f32[1,128], index: 3, kind: input, shape index: {}]   ;;  %s295_s4 = inlined_call_operand.<no memory space> [shape: f32[1,1], index: 4, kind: input, shape index: {}]   ;;  %s296_s5 = inlined_call_operand.hbm [shape: f32[1,8], index: 5, kind: output, shape index: {}]  }
   0x1   :  { %v10_v0 = vstv %s295_s4 }
   0x2   :  { %11 = vst [vmem:[#allocation2] sm:$0x1] %v10_v0 }
   0x3   :  { %12 = vsyncpa [#allocation4], 0 }
   0x4   :  { %13 = vsyncpa [#allocation7], 0 }
   0x5   :  { %14 = vsyncpa [#allocation5], 0  ;;  %s20_s22 = sshll.u32 %s291_s0, 4  ;;  %s237_s23 = smov [#allocation3]   ;;  %s21_s22 = int_to_ptr.hbm [resolvable:$true] %s20_s22 }
   0x6   :  { %s22_s24 = sshll.u32 %s237_s23, 4  ;;  %s30_s27 = sshll.u32 %s292_s1, 4  ;;  %s23_s24 = int_to_ptr.vmem [resolvable:$true] %s22_s24  ;;  %s31_s27 = int_to_ptr.hbm [resolvable:$true] %s30_s27 }
   0x7   :  { %25 = dma.hbm_to_vmem [thread:$0]  %s21_s22, 128, %s23_s24, [#allocation4]  }
   0x8   :  { %s238_s28 = smov [#allocation6]   ;;  %s239_s29 = smov 128  }
   0x9   :  { %s32_s4 = sshll.u32 %s238_s28, 4  ;;  %s240_s30 = smov 8   ;;  %s33_s4 = int_to_ptr.vmem [resolvable:$true] %s32_s4 }
   0xa   :  { %38 = dma.hbm_to_vmem [thread:$0]  %s31_s27, 512, %s33_s4, [#allocation7], %s239_s29, %s239_s29, %s240_s30  }
   0xb   :  { %231 = dma.done.wait [#allocation4], 128  }
   0xc   :  { %232 = vsyncadd [#allocation4], 4294967168 }
   0xd   :  { %233 = dma.done.wait [#allocation7], 512  }
   0xe   :  { %234 = vsyncadd [#allocation7], 4294966784  ;;  %v58_v1 = vld [vmem:[#allocation6 + $0x10] sm:$0xff]  ;;  %v59_v2 = vld [vmem:[#allocation6 + $0x18] sm:$0xff]  ;;  %vm66_vm0 = vcmask 261120   ;;  %v241_v10 = vmov 0  }
   0xf   :  { %v56_v3 = vld [vmem:[#allocation6] sm:$0xff]  ;;  %v61_v4 = vpack.c.bf16 %v59_v2, %v58_v1  ;;  %v57_v5 = vld [vmem:[#allocation6 + $0x8] sm:$0xff]  ;;  %v54_v7 = vld [vmem:[#allocation3] sm:$0xff]  ;;  %153 = vset.pattern.permute.xlu0 %v241_v10  ;;  %s135_s10 = sshll.u32 %s296_s5, 4  ;;  %vm126_vm4 = vcmask 57344   ;;  %s136_s10 = int_to_ptr.hbm [resolvable:$true] %s135_s10 }
  0x10   :  { %v60_v6 = vpack.c.bf16 %v57_v5, %v56_v3  ;;  %v55_v8 = vpack.c.bf16 %v54_v7, %v54_v7  ;;  %v87_v9 = vld [vmem:[#allocation2] sm:$0x1] }
  0x11   :  { %76 = vmatpush.bf16.msra.mxu0 %v61_v4  ;;  %90 = vperm.xlu0 %153, %v87_v9   ;;  %v154_v11 = vld [vmem:[%s293_s2] ss:$0 sm:$0xff]  ;;  %s242_s2 = smov [#allocation8]  }
  0x12   :  { %v84_v16 = vld [vmem:[%s294_s3] sm:$0x1]  ;;  %s133_s3 = sshll.u32 %s242_s2, 4  ;;  %s134_s3 = int_to_ptr.vmem [resolvable:$true] %s133_s3 }
  0x13   :  { %v85_v18 = vpack.c.bf16 %v84_v16, %v84_v16 }
  0x15   :  { %77 = vmatpush.bf16.msra.mxu0 %v60_v6 }
  0x18   :  { %146 = vmatmul.msk.bf16.vlgmr.msra.gmra.mxu0 %vm66_vm0, %v55_v8 }
  0x83   :  { %v91_v19 = vpop.permute.xlu0 %90 }
  0x84   :  { %v93_v20 = vperm.slane %v91_v19, 0 }
  0x95   :  { %v79_v12 = vpop.f32.mrf.mxu0 }
  0x96   :  { %v80_v13 = vadd.f32 %v154_v11, %v79_v12 }
  0x98   :  { %v83_v14 = vmax.f32 %v80_v13, 0.0 }
  0x9a   :  { %v86_v15 = vpack.c.bf16 %v83_v14, %v83_v14 }
  0x9c   :  { %101 = vmatpush.bf16.xpose.msra.mxu1 %v86_v15 }
  0x9d   :  { %v81_v17 = vpop.f32.mrf.mxu0 }
  0xa3   :  { %102 = vmatmul.bf16.vlgmr.msra.gmra.mxu1 %v85_v18 }
 0x120   :  { %v103_v21 = vpop.f32.mrf.mxu1 }
 0x121   :  { %v104_v22 = vadd.f32 %v103_v21, %v93_v20 }
 0x123   :  { %v107_v23 = vsub.f32 0.0, %v104_v22 }
 0x125   :  { %v108_v24 = vmul.f32 1.442695, %v107_v23 }
 0x127   :  { %155 = vpow2.f32 %v108_v24 }
 0x128   :  { %v105_v25 = vpop.f32.mrf.mxu1 }
 0x12d   :  { %v156_v26 = vpop.eup %155 }
 0x12e   :  { %v110_v27 = vadd.f32 1.0, %v156_v26 }
 0x130   :  { %157 = vrcp.f32 %v110_v27  ;;  %v122_v31 = vand.u32 2147483648, %v110_v27  ;;  %v120_v33 = vand.u32 2147483647, %v110_v27  ;;  %vm116_vm2 = vweird.f32 %v110_v27 }
 0x132   :  { %v123_v35 = vor.u32 1.1754944e-38, %v122_v31  ;;  %vm121_vm5 = vcmp.eq.f32.partialorder %v120_v33, 8.507059e+37 }
 0x136   :  { %v158_v28 = vpop.eup %157 }
 0x137   :  { %v112_v29 = vmul.f32 %v158_v28, %v110_v27  ;;  %vm117_vm1 = vweird.f32 %v158_v28 }
 0x138   :  { %vm118_vm3 = vmor %vm116_vm2, %vm117_vm1 }
 0x139   :  { %v113_v30 = vsub.f32 1.0, %v112_v29 }
 0x13b   :  { %v114_v32 = vmul.f32 %v158_v28, %v113_v30 }
 0x13d   :  { %v115_v34 = vadd.f32 %v158_v28, %v114_v32 }
 0x13f   :  { %v119_v36 = vsel %vm118_vm3, %v158_v28, %v115_v34 }
 0x140   :  { %v124_v37 = vsel %vm121_vm5, %v123_v35, %v119_v36 }
 0x141   :  { %127 = vst.msk [vmem:[#allocation8] sm:$0x1] %vm126_vm4, %v124_v37 }
 0x142   :  { %138 = dma.vmem_to_hbm [thread:$0]  %s134_s3, 16, %s136_s10, [#allocation5]  }
 0x143   :  { %235 = dma.done.wait [#allocation5], 16  }
 0x144   :  { %236 = vsyncadd [#allocation5], 4294967280 }
 0x145   :  { %143 = vsyncpa [#allocation4], 1 }
 0x146   :  { %144 = vsyncpa [#allocation7], 1 }
 0x147   :  { %145 = vsyncpa [#allocation5], 1 }

</bundles_post_ra>
